<compile_context>
chip_gen: v5e
topology: v5e:2x2
jax: 0.10.0
libtpu: 0.0.40
codegen_flags: <defaults>
</compile_context>

<pallas_src>
import jax
import jax.numpy as jnp
from jax.experimental import pallas as pl
from jax.experimental.pallas import tpu as pltpu


def _linear_kernel(x_ref, w_ref, b_ref, o_ref):
    # x: (tile_b, obs_pad), w: (obs_pad, act_pad) [pre-transposed], b: (1, act_pad)
    o = jnp.dot(x_ref[...], w_ref[...], preferred_element_type=jnp.float32)
    o_ref[...] = (o + b_ref[...]).astype(o_ref.dtype)


def _round_up(x: int, m: int) -> int:
    return ((x + m - 1) // m) * m


def linear_policy_forward(obs, weight, bias, *, block_b: int = 512):
    """obs: (B, obs_len) f32, weight: (act_len, obs_len) f32, bias: (act_len,) f32.

    Returns (B, act_len), matching torch F.linear(obs, weight, bias).
    """
    B, obs_len = obs.shape
    act_len = weight.shape[0]

    # (8, 128)-friendly padded shapes; zero padding keeps the contraction exact.
    obs_pad = _round_up(obs_len, 128)
    act_pad = _round_up(act_len, 128)
    tile_b = block_b if B > block_b else _round_up(B, 8)
    b_pad = _round_up(B, tile_b)

    x_p = jnp.zeros((b_pad, obs_pad), obs.dtype).at[:B, :obs_len].set(obs)
    # Pre-transpose weight once in the wrapper -> no XLU transpose in the kernel.
    w_p = jnp.zeros((obs_pad, act_pad), weight.dtype).at[:obs_len, :act_len].set(weight.T)
    b_vec = jnp.zeros((1, act_pad), bias.dtype).at[0, :act_len].set(bias)
    # NOTE: on v6e/v7x with large B one could cast x_p/w_p to bfloat16 here
    # (keeping preferred_element_type=f32); kept f32 for bit-tight reference check.

    nb = b_pad // tile_b

    if nb == 1:
        # Single block, no grid: whole padded arrays resident in VMEM.
        out_p = pl.pallas_call(
            _linear_kernel,
            out_shape=jax.ShapeDtypeStruct((b_pad, act_pad), obs.dtype),
            in_specs=[
                pl.BlockSpec(memory_space=pltpu.MemorySpace.VMEM),
                pl.BlockSpec(memory_space=pltpu.MemorySpace.VMEM),
                pl.BlockSpec(memory_space=pltpu.MemorySpace.VMEM),
            ],
            out_specs=pl.BlockSpec(memory_space=pltpu.MemorySpace.VMEM),
        )(x_p, w_p, b_vec)
    else:
        # Batch-tiled grid, parallel across cores (v7x megacore), weight/bias reused.
        out_p = pl.pallas_call(
            _linear_kernel,
            out_shape=jax.ShapeDtypeStruct((b_pad, act_pad), obs.dtype),
            grid=(nb,),
            in_specs=[
                pl.BlockSpec((tile_b, obs_pad), lambda i: (i, 0)),
                pl.BlockSpec((obs_pad, act_pad), lambda i: (0, 0)),
                pl.BlockSpec((1, act_pad), lambda i: (0, 0)),
            ],
            out_specs=pl.BlockSpec((tile_b, act_pad), lambda i: (i, 0)),
            compiler_params=pltpu.CompilerParams(
                dimension_semantics=("parallel",)
            ),
        )(x_p, w_p, b_vec)

    return out_p[:B, :act_len]


if __name__ == "__main__":
    # HalfCheetah-v4: obs_length=17, act_length=6.
    obs_length, act_length = 17, 6

    key = jax.random.PRNGKey(0)
    k_obs, k_w, k_b, k_obs2 = jax.random.split(key, 4)

    # PyTorch-default-like uniform init, bound = 1/sqrt(fan_in).
    bound = 1.0 / jnp.sqrt(jnp.float32(obs_length))
    weight = jax.random.uniform(
        k_w, (act_length, obs_length), dtype=jnp.float32, minval=-bound, maxval=bound
    )
    bias = jax.random.uniform(
        k_b, (act_length,), dtype=jnp.float32, minval=-bound, maxval=bound
    )

    # 1) Small batch -> single-block (no grid) path.
    B1 = 4
    obs1 = jax.random.normal(k_obs, (B1, obs_length), dtype=jnp.float32)
    out1 = jax.block_until_ready(linear_policy_forward(obs1, weight, bias))
    ref1 = obs1 @ weight.T + bias
    assert out1.shape == (B1, act_length)
    assert jnp.allclose(out1, ref1, atol=1e-5, rtol=1e-5)

    # 2) Batch larger than block_b -> tiled "parallel" grid path (small block_b
    #    here only to exercise the tiled path cheaply; default is 512 rows).
    B2 = 20
    obs2 = jax.random.normal(k_obs2, (B2, obs_length), dtype=jnp.float32)
    out2 = jax.block_until_ready(
        linear_policy_forward(obs2, weight, bias, block_b=8)
    )
    ref2 = obs2 @ weight.T + bias
    assert out2.shape == (B2, act_length)
    assert jnp.allclose(out2, ref2, atol=1e-5, rtol=1e-5)

    print("KERNEL_OK")
</pallas_src>

<mosaic_0001>
module attributes {stable_mosaic.version = 11 : i64} {
  func.func @_linear_kernel(%arg0: memref<8x128xf32, #tpu.memory_space<vmem>>, %arg1: memref<128x128xf32, #tpu.memory_space<vmem>>, %arg2: memref<1x128xf32, #tpu.memory_space<vmem>>, %arg3: memref<8x128xf32, #tpu.memory_space<vmem>>) attributes {dimension_semantics = [], scalar_prefetch = 0 : i64, scratch_operands = 0 : i64, tpu.core_type = #tpu.core_type<tc>} {
    %c0 = arith.constant 0 : index
    %c0_0 = arith.constant 0 : index
    %0 = vector.load %arg0[%c0, %c0_0] : memref<8x128xf32, #tpu.memory_space<vmem>>, vector<8x128xf32>
    %c0_1 = arith.constant 0 : index
    %c0_2 = arith.constant 0 : index
    %1 = vector.load %arg1[%c0_1, %c0_2] : memref<128x128xf32, #tpu.memory_space<vmem>>, vector<128x128xf32>
    %cst = arith.constant dense<0.000000e+00> : vector<8x128xf32>
    %2 = tpu.matmul %0, %1, %cst {dimension_numbers = #tpu.dot_dimension_numbers<[1], [0], [0], [1], [0, 0, 1, 1], [], []>} : vector<8x128xf32>, vector<128x128xf32>, vector<8x128xf32> -> vector<8x128xf32>
    %c0_3 = arith.constant 0 : index
    %c0_4 = arith.constant 0 : index
    %3 = vector.load %arg2[%c0_3, %c0_4] : memref<1x128xf32, #tpu.memory_space<vmem>>, vector<1x128xf32>
    %4 = vector.broadcast %3 : vector<1x128xf32> to vector<8x128xf32>
    %5 = arith.addf %2, %4 : vector<8x128xf32>
    %c0_5 = arith.constant 0 : index
    %c0_6 = arith.constant 0 : index
    %6 = vector.load %arg3[%c0_5, %c0_6] : memref<8x128xf32, #tpu.memory_space<vmem>>, vector<8x128xf32>
    tpu.vector_store %arg3[%c0_5, %c0_6], %5 {strides = array<i32>} : memref<8x128xf32, #tpu.memory_space<vmem>>, vector<8x128xf32>,
    return
  }
}

</mosaic_0001>

<bundles_post_ra>
// kernel: tpu_custom_call.1
= control target key start
LH: loop header
LB: loop body
LE: loop exit
PB: predicated region body
PF: predicated region fallthrough
CT: control target
= control target key end

     0   :  { %8 = vsyncpa [#allocation3], 0  ;;  %s226_s0 = inlined_call_operand.hbm [shape: f32[8,128], index: 0, kind: input, shape index: {}]   ;;  %s227_s1 = inlined_call_operand.hbm [shape: f32[128,128], index: 1, kind: input, shape index: {}]   ;;  %s228_s2 = inlined_call_operand.vmem [shape: f32[1,128], index: 2, kind: input, shape index: {}]   ;;  %s229_s3 = inlined_call_operand.hbm [shape: f32[8,128], index: 3, kind: output, shape index: {}]  }
   0x1   :  { %9 = vsyncpa [#allocation6], 0 }
   0x2   :  { %10 = vsyncpa [#allocation4], 0  ;;  %s16_s14 = sshll.u32 %s226_s0, 4  ;;  %s189_s15 = smov [#allocation2]   ;;  %s17_s14 = int_to_ptr.hbm [resolvable:$true] %s16_s14 }
   0x3   :  { %s18_s16 = sshll.u32 %s189_s15, 4  ;;  %s26_s19 = sshll.u32 %s227_s1, 4  ;;  %s19_s16 = int_to_ptr.vmem [resolvable:$true] %s18_s16  ;;  %s27_s19 = int_to_ptr.hbm [resolvable:$true] %s26_s19 }
   0x4   :  { %21 = dma.hbm_to_vmem [thread:$0]  %s17_s14, 128, %s19_s16, [#allocation3]  }
   0x5   :  { %s190_s20 = smov [#allocation5]   ;;  %s191_s22 = smov 128  }
   0x6   :  { %s28_s21 = sshll.u32 %s190_s20, 4  ;;  %s192_s23 = smov 8   ;;  %s29_s21 = int_to_ptr.vmem [resolvable:$true] %s28_s21 }
   0x7   :  { %34 = dma.hbm_to_vmem [thread:$0]  %s27_s19, 2048, %s29_s21, [#allocation6], %s191_s22, %s191_s22, %s192_s23  }
   0x8   :  { %183 = dma.done.wait [#allocation3], 128  }
   0x9   :  { %184 = vsyncadd [#allocation3], 4294967168 }
   0xa   :  { %185 = dma.done.wait [#allocation6], 2048  }
   0xb   :  { %186 = vsyncadd [#allocation6], 4294965248  ;;  %v61_v0 = vld [vmem:[#allocation5 + $0x78] sm:$0xff]  ;;  %v60_v1 = vld [vmem:[#allocation5 + $0x70] sm:$0xff]  ;;  %s193_s24 = smov [#allocation7]   ;;  %s94_s28 = sshll.u32 %s229_s3, 4  ;;  %s95_s28 = int_to_ptr.hbm [resolvable:$true] %s94_s28 }
   0xc   :  { %66 = vmatpush.msra.mxu0 %v61_v0  ;;  %v59_v2 = vld [vmem:[#allocation5 + $0x68] sm:$0xff]  ;;  %v58_v3 = vld [vmem:[#allocation5 + $0x60] sm:$0xff]  ;;  %v57_v4 = vld [vmem:[#allocation5 + $0x58] sm:$0xff]  ;;  %s92_s25 = sshll.u32 %s193_s24, 4  ;;  %s93_s25 = int_to_ptr.vmem [resolvable:$true] %s92_s25 }
   0xd   :  { %v56_v5 = vld [vmem:[#allocation5 + $0x50] sm:$0xff]  ;;  %v55_v6 = vld [vmem:[#allocation5 + $0x48] sm:$0xff]  ;;  %v54_v7 = vld [vmem:[#allocation5 + $0x40] sm:$0xff] }
   0xe   :  { %67 = vmatpush.msra.mxu0 %v60_v1  ;;  %v53_v8 = vld [vmem:[#allocation5 + $0x38] sm:$0xff]  ;;  %v52_v9 = vld [vmem:[#allocation5 + $0x30] sm:$0xff]  ;;  %v51_v10 = vld [vmem:[#allocation5 + $0x28] sm:$0xff] }
   0xf   :  { %v50_v11 = vld [vmem:[#allocation5 + $0x20] sm:$0xff]  ;;  %v49_v12 = vld [vmem:[#allocation5 + $0x18] sm:$0xff]  ;;  %v48_v13 = vld [vmem:[#allocation5 + $0x10] sm:$0xff] }
  0x10   :  { %68 = vmatpush.msra.mxu0 %v59_v2  ;;  %v47_v14 = vld [vmem:[#allocation5 + $0x8] sm:$0xff]  ;;  %v46_v15 = vld [vmem:[#allocation5] sm:$0xff]  ;;  %v45_v16 = vld [vmem:[#allocation2] sm:$0xff] }
  0x11   :  { %v110_v17 = vld [vmem:[%s228_s2] ss:$0 sm:$0xff] }
  0x12   :  { %69 = vmatpush.msra.mxu0 %v58_v3 }
  0x14   :  { %70 = vmatpush.msra.mxu0 %v57_v4 }
  0x16   :  { %71 = vmatpush.msra.mxu0 %v56_v5 }
  0x18   :  { %72 = vmatpush.msra.mxu0 %v55_v6 }
  0x1a   :  { %73 = vmatpush.msra.mxu0 %v54_v7 }
  0x1c   :  { %74 = vmatpush.msra.mxu0 %v53_v8 }
  0x1e   :  { %75 = vmatpush.msra.mxu0 %v52_v9 }
  0x20   :  { %76 = vmatpush.msra.mxu0 %v51_v10 }
  0x22   :  { %77 = vmatpush.msra.mxu0 %v50_v11 }
  0x24   :  { %78 = vmatpush.msra.mxu0 %v49_v12 }
  0x26   :  { %79 = vmatpush.msra.mxu0 %v48_v13 }
  0x28   :  { %80 = vmatpush.msra.mxu0 %v47_v14 }
  0x2a   :  { %81 = vmatpush.msra.mxu0 %v46_v15 }
  0x2b   :  { %82 = vmatmul.f32.vlgmr.msra.gmra.mxu0 %v45_v16 }
  0xa8   :  { %v83_v18 = vpop.f32.mrf.mxu0 }
  0xa9   :  { %v84_v19 = vadd.f32 %v110_v17, %v83_v18 }
  0xab   :  { %86 = vst [vmem:[#allocation7] sm:$0xff] %v84_v19 }
  0xac   :  { %97 = dma.vmem_to_hbm [thread:$0]  %s93_s25, 128, %s95_s28, [#allocation4]  }
  0xad   :  { %187 = dma.done.wait [#allocation4], 128  }
  0xae   :  { %188 = vsyncadd [#allocation4], 4294967168 }
  0xaf   :  { %102 = vsyncpa [#allocation3], 1 }
  0xb0   :  { %103 = vsyncpa [#allocation6], 1 }
  0xb1   :  { %104 = vsyncpa [#allocation4], 1 }

</bundles_post_ra>
